<compile_context>
chip_gen: v6e
topology: v6e:2x2x1
jax: 0.10.0
libtpu: 0.0.40
codegen_flags: <defaults>
</compile_context>

<pallas_src>
import functools

import jax
import jax.numpy as jnp
from jax.experimental import pallas as pl
from jax.experimental.pallas import tpu as pltpu

INPUT_DIM = 16
QUERY_DIM = 32
VALUE_DIM = 32
HEADS = 8


def _mha_kernel(x_ref, y_ref,
                wq_ref, bq_ref,
                wk_ref, bk_ref,
                wv_ref, bv_ref,
                wfc_ref, bfc_ref,
                o_ref, *, heads):
    x = x_ref[...]                                   # (N, D_in)
    y = y_ref[...]                                   # (M, D_in)
    n, d_in = x.shape
    m = y.shape[0]

    # Broadcast tokens over the head (batch) axis once; everything downstream is
    # head-batched, so there is no per-head lane slicing and no concat epilogue.
    xb = jnp.broadcast_to(x[None, :, :], (heads, n, d_in))   # (H, N, D_in)
    yb = jnp.broadcast_to(y[None, :, :], (heads, m, d_in))   # (H, M, D_in)

    # Batched projections (1/sqrt(Dq) already folded into wq/bq by the wrapper).
    q = jnp.einsum('hnd,hdk->hnk', xb, wq_ref[...],
                   preferred_element_type=jnp.float32) + bq_ref[...]      # (H, N, Dq)
    k = jnp.einsum('hmd,hdk->hmk', yb, wk_ref[...],
                   preferred_element_type=jnp.float32) + bk_ref[...]      # (H, M, Dq)
    v = jnp.einsum('hmd,hdk->hmk', yb, wv_ref[...],
                   preferred_element_type=jnp.float32) + bv_ref[...]      # (H, M, Dv)

    # Scores for all heads in one batched dot_general.
    s = jnp.einsum('hnk,hmk->hnm', q, k,
                   preferred_element_type=jnp.float32)                    # (H, N, M)

    # Single wide softmax chain across all heads; exact reciprocal (the approx
    # EUP reciprocal exceeded the 1e-3 test tolerance).
    s_max = jnp.max(s, axis=-1, keepdims=True)
    e = jnp.exp(s - s_max)
    p = e / jnp.sum(e, axis=-1, keepdims=True)

    # Attention output, head-batched.
    o = jnp.einsum('hnm,hmk->hnk', p, v,
                   preferred_element_type=jnp.float32)                    # (H, N, Dv)

    # concat-over-heads + fc  ==  sum_h ( o[h] @ wfc[h] ) + bfc
    per_head = jnp.einsum('hnk,hko->hno', o, wfc_ref[...],
                          preferred_element_type=jnp.float32)             # (H, N, D_in)
    out = jnp.sum(per_head, axis=0) + bfc_ref[...]                        # (N, D_in)
    o_ref[...] = out.astype(o_ref.dtype)


def prepare_params(params):
    """One-time prep off the hot path: fold 1/sqrt(query_dim) into Wq/bq."""
    wq, bq, wk, bk, wv, bv, wfc, bfc = params
    scale = 1.0 / (wq.shape[-1] ** 0.5)
    return (wq * scale, bq * scale, wk, bk, wv, bv, wfc, bfc)


@jax.jit
def multi_head_attention(x, y, prepared):
    """x: (N, input_dim), y: (M, input_dim); prepared = prepare_params(params)."""
    wq, bq, wk, bk, wv, bv, wfc, bfc = prepared
    N, input_dim = x.shape
    heads = wq.shape[0]

    vmem = pltpu.MemorySpace.VMEM
    kernel = functools.partial(_mha_kernel, heads=heads)

    # Single grid point: all operands (~70 KB total) are DMA'd HBM->VMEM once and
    # stay resident for the whole kernel; output is a single VMEM block store.
    return pl.pallas_call(
        kernel,
        out_shape=jax.ShapeDtypeStruct((N, input_dim), jnp.float32),
        in_specs=[pl.BlockSpec(memory_space=vmem)] * 10,
        out_specs=pl.BlockSpec(memory_space=vmem),
    )(x, y, wq, bq, wk, bk, wv, bv, wfc, bfc)


def _reference(x, y, params):
    wq, bq, wk, bk, wv, bv, wfc, bfc = params
    heads = wq.shape[0]
    outs = []
    for h in range(heads):
        q = x @ wq[h] + bq[h, 0]
        k = y @ wk[h] + bk[h, 0]
        v = y @ wv[h] + bv[h, 0]
        s = (q @ k.T) / (wq.shape[-1] ** 0.5)
        p = jax.nn.softmax(s, axis=-1)
        outs.append(p @ v)
    cat = jnp.concatenate(outs, axis=-1)
    wfc_flat = wfc.reshape(heads * wfc.shape[1], wfc.shape[2])
    return cat @ wfc_flat + bfc[0]


def _init_params(key):
    ks = jax.random.split(key, 8)
    wq = jax.random.normal(ks[0], (HEADS, INPUT_DIM, QUERY_DIM), jnp.float32) * 0.1
    bq = jax.random.normal(ks[1], (HEADS, 1, QUERY_DIM), jnp.float32) * 0.1
    wk = jax.random.normal(ks[2], (HEADS, INPUT_DIM, QUERY_DIM), jnp.float32) * 0.1
    bk = jax.random.normal(ks[3], (HEADS, 1, QUERY_DIM), jnp.float32) * 0.1
    wv = jax.random.normal(ks[4], (HEADS, INPUT_DIM, VALUE_DIM), jnp.float32) * 0.1
    bv = jax.random.normal(ks[5], (HEADS, 1, VALUE_DIM), jnp.float32) * 0.1
    wfc = jax.random.normal(ks[6], (HEADS, VALUE_DIM, INPUT_DIM), jnp.float32) * 0.1
    bfc = jax.random.normal(ks[7], (1, INPUT_DIM), jnp.float32) * 0.1
    return (wq, bq, wk, bk, wv, bv, wfc, bfc)


if __name__ == "__main__":
    key = jax.random.PRNGKey(0)
    kx, ky, kp = jax.random.split(key, 3)

    N, M = 8, 8  # small token counts for x and y
    x = jax.random.normal(kx, (N, INPUT_DIM), jnp.float32)
    y = jax.random.normal(ky, (M, INPUT_DIM), jnp.float32)
    params = _init_params(kp)

    prepared = prepare_params(params)       # one-time weight prep (off hot path)
    out = multi_head_attention(x, y, prepared)
    out = jax.block_until_ready(out)

    ref = _reference(x, y, params)
    assert out.shape == (N, INPUT_DIM)
    # Exact-reciprocal softmax: only matmul-reassociation noise remains (~1e-6).
    assert jnp.allclose(out, ref, atol=1e-4, rtol=1e-4), \
        f"max err {jnp.max(jnp.abs(out - ref))}"

    print("KERNEL_OK")
</pallas_src>

<mosaic_0001>
module attributes {stable_mosaic.version = 11 : i64} {
  func.func @_mha_kernel(%arg0: memref<8x16xf32, #tpu.memory_space<vmem>>, %arg1: memref<8x16xf32, #tpu.memory_space<vmem>>, %arg2: memref<8x16x32xf32, #tpu.memory_space<vmem>>, %arg3: memref<8x1x32xf32, #tpu.memory_space<vmem>>, %arg4: memref<8x16x32xf32, #tpu.memory_space<vmem>>, %arg5: memref<8x1x32xf32, #tpu.memory_space<vmem>>, %arg6: memref<8x16x32xf32, #tpu.memory_space<vmem>>, %arg7: memref<8x1x32xf32, #tpu.memory_space<vmem>>, %arg8: memref<8x32x16xf32, #tpu.memory_space<vmem>>, %arg9: memref<1x16xf32, #tpu.memory_space<vmem>>, %arg10: memref<8x16xf32, #tpu.memory_space<vmem>>) attributes {dimension_semantics = [], scalar_prefetch = 0 : i64, scratch_operands = 0 : i64, tpu.core_type = #tpu.core_type<tc>} {
    %c0 = arith.constant 0 : index
    %c0_0 = arith.constant 0 : index
    %0 = vector.load %arg0[%c0, %c0_0] : memref<8x16xf32, #tpu.memory_space<vmem>>, vector<8x16xf32>
    %c0_1 = arith.constant 0 : index
    %c0_2 = arith.constant 0 : index
    %1 = vector.load %arg1[%c0_1, %c0_2] : memref<8x16xf32, #tpu.memory_space<vmem>>, vector<8x16xf32>
    %2 = vector.shape_cast %0 : vector<8x16xf32> to vector<1x8x16xf32>
    %3 = vector.shape_cast %2 : vector<1x8x16xf32> to vector<1x8x16xf32>
    %4 = vector.broadcast %3 : vector<1x8x16xf32> to vector<8x8x16xf32>
    %5 = vector.shape_cast %1 : vector<8x16xf32> to vector<1x8x16xf32>
    %6 = vector.shape_cast %5 : vector<1x8x16xf32> to vector<1x8x16xf32>
    %7 = vector.broadcast %6 : vector<1x8x16xf32> to vector<8x8x16xf32>
    %c0_3 = arith.constant 0 : index
    %c0_4 = arith.constant 0 : index
    %c0_5 = arith.constant 0 : index
    %8 = vector.load %arg2[%c0_3, %c0_4, %c0_5] : memref<8x16x32xf32, #tpu.memory_space<vmem>>, vector<8x16x32xf32>
    "tpu.trace_start"() <{level = 10 : i32, message = "hnd,hdk->hnk"}> : () -> ()
    %cst = arith.constant dense<0.000000e+00> : vector<8x8x32xf32>
    %9 = tpu.matmul %4, %8, %cst {dimension_numbers = #tpu.dot_dimension_numbers<[2], [1], [1], [2], [0, 0, 0, 1, 1, 2], [0], [0]>} : vector<8x8x16xf32>, vector<8x16x32xf32>, vector<8x8x32xf32> -> vector<8x8x32xf32>
    "tpu.trace_stop"() : () -> ()
    %c0_6 = arith.constant 0 : index
    %c0_7 = arith.constant 0 : index
    %c0_8 = arith.constant 0 : index
    %10 = vector.load %arg3[%c0_6, %c0_7, %c0_8] : memref<8x1x32xf32, #tpu.memory_space<vmem>>, vector<8x1x32xf32>
    %11 = vector.broadcast %10 : vector<8x1x32xf32> to vector<8x8x32xf32>
    %12 = arith.addf %9, %11 : vector<8x8x32xf32>
    %c0_9 = arith.constant 0 : index
    %c0_10 = arith.constant 0 : index
    %c0_11 = arith.constant 0 : index
    %13 = vector.load %arg4[%c0_9, %c0_10, %c0_11] : memref<8x16x32xf32, #tpu.memory_space<vmem>>, vector<8x16x32xf32>
    "tpu.trace_start"() <{level = 10 : i32, message = "hmd,hdk->hmk"}> : () -> ()
    %cst_12 = arith.constant dense<0.000000e+00> : vector<8x8x32xf32>
    %14 = tpu.matmul %7, %13, %cst_12 {dimension_numbers = #tpu.dot_dimension_numbers<[2], [1], [1], [2], [0, 0, 0, 1, 1, 2], [0], [0]>} : vector<8x8x16xf32>, vector<8x16x32xf32>, vector<8x8x32xf32> -> vector<8x8x32xf32>
    "tpu.trace_stop"() : () -> ()
    %c0_13 = arith.constant 0 : index
    %c0_14 = arith.constant 0 : index
    %c0_15 = arith.constant 0 : index
    %15 = vector.load %arg5[%c0_13, %c0_14, %c0_15] : memref<8x1x32xf32, #tpu.memory_space<vmem>>, vector<8x1x32xf32>
    %16 = vector.broadcast %15 : vector<8x1x32xf32> to vector<8x8x32xf32>
    %17 = arith.addf %14, %16 : vector<8x8x32xf32>
    %c0_16 = arith.constant 0 : index
    %c0_17 = arith.constant 0 : index
    %c0_18 = arith.constant 0 : index
    %18 = vector.load %arg6[%c0_16, %c0_17, %c0_18] : memref<8x16x32xf32, #tpu.memory_space<vmem>>, vector<8x16x32xf32>
    "tpu.trace_start"() <{level = 10 : i32, message = "hmd,hdk->hmk"}> : () -> ()
    %cst_19 = arith.constant dense<0.000000e+00> : vector<8x8x32xf32>
    %19 = tpu.matmul %7, %18, %cst_19 {dimension_numbers = #tpu.dot_dimension_numbers<[2], [1], [1], [2], [0, 0, 0, 1, 1, 2], [0], [0]>} : vector<8x8x16xf32>, vector<8x16x32xf32>, vector<8x8x32xf32> -> vector<8x8x32xf32>
    "tpu.trace_stop"() : () -> ()
    %c0_20 = arith.constant 0 : index
    %c0_21 = arith.constant 0 : index
    %c0_22 = arith.constant 0 : index
    %20 = vector.load %arg7[%c0_20, %c0_21, %c0_22] : memref<8x1x32xf32, #tpu.memory_space<vmem>>, vector<8x1x32xf32>
    %21 = vector.broadcast %20 : vector<8x1x32xf32> to vector<8x8x32xf32>
    %22 = arith.addf %19, %21 : vector<8x8x32xf32>
    "tpu.trace_start"() <{level = 10 : i32, message = "hnk,hmk->hnm"}> : () -> ()
    %cst_23 = arith.constant dense<0.000000e+00> : vector<8x8x8xf32>
    %23 = tpu.matmul %12, %17, %cst_23 {dimension_numbers = #tpu.dot_dimension_numbers<[2], [2], [1], [1], [0, 0, 0, 1, 1, 1], [0], [0]>} : vector<8x8x32xf32>, vector<8x8x32xf32>, vector<8x8x8xf32> -> vector<8x8x8xf32>
    "tpu.trace_stop"() : () -> ()
    %cst_24 = arith.constant dense<0xFF800000> : vector<8x8xf32>
    %24 = vector.multi_reduction <maximumf>, %23, %cst_24 [2] : vector<8x8x8xf32> to vector<8x8xf32>
    %25 = vector.shape_cast %24 : vector<8x8xf32> to vector<8x8x1xf32>
    %26 = vector.broadcast %25 : vector<8x8x1xf32> to vector<8x8x8xf32>
    %27 = arith.subf %23, %26 : vector<8x8x8xf32>
    %28 = math.exp %27 : vector<8x8x8xf32>
    %cst_25 = arith.constant dense<0.000000e+00> : vector<8x8xf32>
    %29 = vector.multi_reduction <add>, %28, %cst_25 [2] : vector<8x8x8xf32> to vector<8x8xf32>
    %30 = vector.shape_cast %29 : vector<8x8xf32> to vector<8x8x1xf32>
    %31 = vector.broadcast %30 : vector<8x8x1xf32> to vector<8x8x8xf32>
    %32 = arith.divf %28, %31 : vector<8x8x8xf32>
    "tpu.trace_start"() <{level = 10 : i32, message = "hnm,hmk->hnk"}> : () -> ()
    %cst_26 = arith.constant dense<0.000000e+00> : vector<8x8x32xf32>
    %33 = tpu.matmul %32, %22, %cst_26 {dimension_numbers = #tpu.dot_dimension_numbers<[2], [1], [1], [2], [0, 0, 0, 1, 1, 2], [0], [0]>} : vector<8x8x8xf32>, vector<8x8x32xf32>, vector<8x8x32xf32> -> vector<8x8x32xf32>
    "tpu.trace_stop"() : () -> ()
    %c0_27 = arith.constant 0 : index
    %c0_28 = arith.constant 0 : index
    %c0_29 = arith.constant 0 : index
    %34 = vector.load %arg8[%c0_27, %c0_28, %c0_29] : memref<8x32x16xf32, #tpu.memory_space<vmem>>, vector<8x32x16xf32>
    "tpu.trace_start"() <{level = 10 : i32, message = "hnk,hko->hno"}> : () -> ()
    %cst_30 = arith.constant dense<0.000000e+00> : vector<8x8x16xf32>
    %35 = tpu.matmul %33, %34, %cst_30 {dimension_numbers = #tpu.dot_dimension_numbers<[2], [1], [1], [2], [0, 0, 0, 1, 1, 2], [0], [0]>} : vector<8x8x32xf32>, vector<8x32x16xf32>, vector<8x8x16xf32> -> vector<8x8x16xf32>
    "tpu.trace_stop"() : () -> ()
    %cst_31 = arith.constant dense<0.000000e+00> : vector<8x16xf32>
    %36 = vector.multi_reduction <add>, %35, %cst_31 [0] : vector<8x8x16xf32> to vector<8x16xf32>
    %c0_32 = arith.constant 0 : index
    %c0_33 = arith.constant 0 : index
    %37 = vector.load %arg9[%c0_32, %c0_33] : memref<1x16xf32, #tpu.memory_space<vmem>>, vector<1x16xf32>
    %38 = vector.broadcast %37 : vector<1x16xf32> to vector<8x16xf32>
    %39 = arith.addf %36, %38 : vector<8x16xf32>
    %c0_34 = arith.constant 0 : index
    %c0_35 = arith.constant 0 : index
    %40 = vector.load %arg10[%c0_34, %c0_35] : memref<8x16xf32, #tpu.memory_space<vmem>>, vector<8x16xf32>
    tpu.vector_store %arg10[%c0_34, %c0_35], %39 {strides = array<i32>} : memref<8x16xf32, #tpu.memory_space<vmem>>, vector<8x16xf32>,
    return
  }
}

</mosaic_0001>

<bundles_post_ra>
// kernel: multi_head_attention.1
= control target key start
LH: loop header
LB: loop body
LE: loop exit
PB: predicated region body
PF: predicated region fallthrough
CT: control target
= control target key end

     0   :  { %15 = vsyncpa [#allocation3], 0  ;;  %s5314_s0 = inlined_call_operand.hbm [shape: f32[8,16], index: 0, kind: input, shape index: {}]   ;;  %s5315_s1 = inlined_call_operand.hbm [shape: f32[8,16], index: 1, kind: input, shape index: {}]   ;;  %s5316_s2 = inlined_call_operand.vmem [shape: f32[8,16,32], index: 2, kind: input, shape index: {}]   ;;  %s5317_s3 = inlined_call_operand.hbm [shape: f32[8,1,32], index: 3, kind: input, shape index: {}]   ;;  %s5318_s4 = inlined_call_operand.vmem [shape: f32[8,16,32], index: 4, kind: input, shape index: {}]   ;;  %s5319_s5 = inlined_call_operand.hbm [shape: f32[8,1,32], index: 5, kind: input, shape index: {}]   ;;  %s5320_s6 = inlined_call_operand.vmem [shape: f32[8,16,32], index: 6, kind: input, shape index: {}]   ;;  %s5321_s7 = inlined_call_operand.vmem [shape: f32[8,1,32], index: 7, kind: input, shape index: {}]   ;;  %s5322_s8 = inlined_call_operand.vmem [shape: f32[8,32,16], index: 8, kind: input, shape index: {}]   ;;  %s5323_s9 = inlined_call_operand.vmem [shape: f32[1,16], index: 9, kind: input, shape index: {}]   ;;  %s5324_s10 = inlined_call_operand.hbm [shape: f32[8,16], index: 10, kind: output, shape index: {}]  }
   0x1   :  { %16 = vsyncpa [#allocation6], 0 }
   0x2   :  { %17 = vsyncpa [#allocation9], 0 }
   0x3   :  { %18 = vsyncpa [#allocation4], 0  ;;  %s4641_s13 = smov [#allocation5]   ;;  %s4642_s15 = smov [#allocation2]  }
   0x4   :  { %s35_s14 = sshll.u32 %s4641_s13, 4  ;;  %s25_s16 = sshll.u32 %s4642_s15, 4  ;;  %s36_s14 = int_to_ptr.vmem [resolvable:$true] %s35_s14  ;;  %s26_s16 = int_to_ptr.vmem [resolvable:$true] %s25_s16 }
   0x5   :  { %s4541_s17 = scalar_lea.vmem %s36_s14, 128  ;;  %p4546_p1 = scmp.lt.s32.totalorder %s36_s14, %s36_s14 }
   0x6   :  { %p4542_p0 = scmp.ne.s32.totalorder %s36_s14, %s4541_s17  ;;  %p4547_p2 = scmp.lt.s32.totalorder %s4541_s17, %s4541_s17 }
   0x8   :  { %p4548_p3 = por %p4547_p2, %p4546_p1 }
   0xa   :  { %p4549_p4 = pnand %p4548_p3, %p4542_p0 }
   0xc   :  { %4552 = shalt.err (!%p4549_p4)
}
   0xd   :  { %38 = dma.hbm_to_vmem [thread:$0]  %s5315_s1, 128, %s36_s14, [#allocation6]  }
   0xe   :  { %s4561_s20 = scalar_lea.vmem %s26_s16, 128  ;;  %p4566_p6 = scmp.lt.s32.totalorder %s26_s16, %s26_s16 }
   0xf   :  { %p4562_p5 = scmp.ne.s32.totalorder %s26_s16, %s4561_s20  ;;  %p4567_p7 = scmp.lt.s32.totalorder %s4561_s20, %s4561_s20 }
  0x11   :  { %p4568_p8 = por %p4567_p7, %p4566_p6 }
  0x13   :  { %p4569_p9 = pnand %p4568_p8, %p4562_p5 }
  0x15   :  { %4572 = shalt.err (!%p4569_p9)
}
  0x16   :  { %28 = dma.hbm_to_vmem [thread:$0]  %s5314_s0, 128, %s26_s16, [#allocation3]  }
  0x17   :  { %s4643_s23 = smov [#allocation7]  }
  0x18   :  { %s46_s24 = sshll.u32 %s4643_s23, 4  ;;  %s47_s24 = int_to_ptr.vmem [resolvable:$true] %s46_s24 }
  0x19   :  { %s4581_s25 = scalar_lea.vmem %s47_s24, 128  ;;  %p4586_p11 = scmp.lt.s32.totalorder %s47_s24, %s47_s24 }
  0x1a   :  { %p4582_p10 = scmp.ne.s32.totalorder %s47_s24, %s4581_s25  ;;  %p4587_p12 = scmp.lt.s32.totalorder %s4581_s25, %s4581_s25 }
  0x1c   :  { %p4588_p13 = por %p4587_p12, %p4586_p11 }
  0x1e   :  { %p4589_p0 = pnand %p4588_p13, %p4582_p10 }
  0x20   :  { %4592 = shalt.err (!%p4589_p0)
}
  0x21   :  { %s4644_s1 = smov 16   ;;  %s4645_s26 = smov 1  }
  0x22   :  { %52 = dma.hbm_to_vmem [thread:$0]  %s5317_s3, 128, %s47_s24, [#allocation6], %s4644_s1, %s4644_s1, %s4645_s26  }
  0x23   :  { %s4646_s29 = smov [#allocation8]  }
  0x24   :  { %s60_s30 = sshll.u32 %s4646_s29, 4  ;;  %s61_s30 = int_to_ptr.vmem [resolvable:$true] %s60_s30 }
  0x25   :  { %s4601_s0 = scalar_lea.vmem %s61_s30, 128  ;;  %p4606_p2 = scmp.lt.s32.totalorder %s61_s30, %s61_s30 }
  0x26   :  { %p4602_p1 = scmp.ne.s32.totalorder %s61_s30, %s4601_s0  ;;  %p4607_p3 = scmp.lt.s32.totalorder %s4601_s0, %s4601_s0 }
  0x28   :  { %p4608_p4 = por %p4607_p3, %p4606_p2 }
  0x2a   :  { %p4609_p5 = pnand %p4608_p4, %p4602_p1 }
  0x2c   :  { %4612 = shalt.err (!%p4609_p5)
}
  0x2d   :  { %66 = dma.hbm_to_vmem [thread:$0]  %s5319_s5, 128, %s61_s30, [#allocation9], %s4644_s1, %s4644_s1, %s4645_s26  }
  0x2e   :  { %4633 = dma.done.wait [#allocation3], 128  }
  0x2f   :  { %4634 = vsyncadd [#allocation3], 4294967168 }
  0x30   :  { %4635 = dma.done.wait [#allocation6], 256  }
  0x31   :  { %4636 = vsyncadd [#allocation6], 4294967040 }
  0x32   :  { %4637 = dma.done.wait [#allocation9], 128  }
  0x33   :  { %4638 = vsyncadd [#allocation9], 4294967168  ;;  %v4647_v0 = vmov 0.0   ;;  %vm4648_vm0 = vmmov 0   ;;  %v90_v1 = vld [vmem:[%s5316_s2 + $0x8] sm:$0xff]  ;;  %v92_v2 = vld [vmem:[%s5316_s2 + $0x18] sm:$0xff] }
  0x34   :  { %4156 = vmatprep.subr.mxu0 %v4647_v0  ;;  %4163 = vmatprep.subr.mxu1 %v4647_v0  ;;  %v89_v3 = vld [vmem:[%s5316_s2] sm:$0xff]  ;;  %v91_v4 = vld [vmem:[%s5316_s2 + $0x10] sm:$0xff]  ;;  %vm161_vm1 = vcmask 130048   ;;  %v94_v6 = vld [vmem:[%s5316_s2 + $0x28] sm:$0xff]  ;;  %vm1992_vm2 = vcmask 261120   ;;  %vm2601_vm3 = vcmask 64512  }
  0x35   :  { %4160 = vmatprep.mubr.msk.f32.mxu0 %vm4648_vm0, %v4647_v0  ;;  %4167 = vmatprep.mubr.msk.f32.mxu1 %vm4648_vm0, %v4647_v0  ;;  %v87_v5 = vld [vmem:[#allocation2] sm:$0xff]  ;;  %v96_v7 = vld [vmem:[%s5316_s2 + $0x38] sm:$0xff]  ;;  %v95_v9 = vld [vmem:[%s5316_s2 + $0x30] sm:$0xff]  ;;  %s4649_s26 = smov [#allocation10]  }
  0x36   :  { %4157 = vmatpush3.msra.mxu0 %v90_v1  ;;  %4164 = vmatpush3.msra.mxu1 %v92_v2  ;;  %v93_v8 = vld [vmem:[%s5316_s2 + $0x20] sm:$0xff]  ;;  %v98_v10 = vld [vmem:[%s5316_s2 + $0x48] sm:$0xff]  ;;  %v100_v11 = vld [vmem:[%s5316_s2 + $0x58] sm:$0xff]  ;;  %s3920_s27 = sshll.u32 %s4649_s26, 4  ;;  %s3921_s27 = int_to_ptr.vmem [resolvable:$true] %s3920_s27 }
  0x37   :  { %4158 = vmatprep.subr.mxu0 %v4647_v0  ;;  %4165 = vmatprep.subr.mxu1 %v4647_v0  ;;  %v97_v12 = vld [vmem:[%s5316_s2 + $0x40] sm:$0xff]  ;;  %v99_v13 = vld [vmem:[%s5316_s2 + $0x50] sm:$0xff]  ;;  %v102_v14 = vld [vmem:[%s5316_s2 + $0x68] sm:$0xff]  ;;  %s4613_s28 = scalar_lea.vmem %s3921_s27, 128  ;;  %p4618_p7 = scmp.lt.s32.totalorder %s3921_s27, %s3921_s27 }
  0x38   :  { %4159 = vmatpush3.msra.mxu0 %v89_v3  ;;  %4166 = vmatpush3.msra.mxu1 %v91_v4  ;;  %v104_v15 = vld [vmem:[%s5316_s2 + $0x78] sm:$0xff]  ;;  %v101_v16 = vld [vmem:[%s5316_s2 + $0x60] sm:$0xff]  ;;  %v103_v17 = vld [vmem:[%s5316_s2 + $0x70] sm:$0xff]  ;;  %p4614_p6 = scmp.ne.s32.totalorder %s3921_s27, %s4613_s28  ;;  %p4619_p8 = scmp.lt.s32.totalorder %s4613_s28, %s4613_s28 }
  0x39   :  { %4161 = vmatmul.mubr.msk.f32.vlgmr.msra.gmra.mxu0 %vm161_vm1, %v87_v5  ;;  %4168 = vmatmul.mubr.msk.f32.vlgmr.msra.gmra.mxu1 %vm161_vm1, %v87_v5  ;;  %v726_v18 = vld [vmem:[%s5318_s4 + $0x8] sm:$0xff]  ;;  %v728_v19 = vld [vmem:[%s5318_s4 + $0x18] sm:$0xff]  ;;  %v725_v20 = vld [vmem:[%s5318_s4] sm:$0xff] }
  0x3a   :  { %4170 = vmatprep.subr.mxu0 %v4647_v0  ;;  %4177 = vmatprep.subr.mxu1 %v4647_v0  ;;  %v727_v21 = vld [vmem:[%s5318_s4 + $0x10] sm:$0xff]  ;;  %v4821_v22 = vld [vmem:[#allocation5] sm:$0xff]  ;;  %v732_v24 = vld [vmem:[%s5318_s4 + $0x38] sm:$0xff]  ;;  %p4620_p9 = por %p4619_p8, %p4618_p7 }
  0x3b   :  { %4171 = vmatpush3.msra.mxu0 %v94_v6  ;;  %4178 = vmatpush3.msra.mxu1 %v96_v7  ;;  %v730_v23 = vld [vmem:[%s5318_s4 + $0x28] sm:$0xff]  ;;  %v729_v25 = vld [vmem:[%s5318_s4 + $0x20] sm:$0xff]  ;;  %v731_v26 = vld [vmem:[%s5318_s4 + $0x30] sm:$0xff] }
  0x3c   :  { %4172 = vmatprep.subr.mxu0 %v4647_v0  ;;  %4179 = vmatprep.subr.mxu1 %v4647_v0  ;;  %v734_v27 = vld [vmem:[%s5318_s4 + $0x48] sm:$0xff]  ;;  %v736_v28 = vld [vmem:[%s5318_s4 + $0x58] sm:$0xff]  ;;  %v733_v29 = vld [vmem:[%s5318_s4 + $0x40] sm:$0xff]  ;;  %p4621_p10 = pnand %p4620_p9, %p4614_p6 }
  0x3d   :  { %4173 = vmatpush3.msra.mxu0 %v93_v8  ;;  %4174 = vmatprep.mubr.msk.f32.mxu0 %vm4648_vm0, %v4647_v0  ;;  %v735_v30 = vld [vmem:[%s5318_s4 + $0x50] sm:$0xff]  ;;  %v738_v31 = vld [vmem:[%s5318_s4 + $0x68] sm:$0xff]  ;;  %v740_v32 = vld [vmem:[%s5318_s4 + $0x78] sm:$0xff] }
  0x3e   :  { %4180 = vmatpush3.msra.mxu1 %v95_v9  ;;  %4181 = vmatprep.mubr.msk.f32.mxu1 %vm4648_vm0, %v4647_v0  ;;  %v737_v33 = vld [vmem:[%s5318_s4 + $0x60] sm:$0xff]  ;;  %v739_v34 = vld [vmem:[%s5318_s4 + $0x70] sm:$0xff]  ;;  %v1361_v35 = vld [vmem:[%s5320_s6 + $0x8] sm:$0xff] }
  0x3f   :  { %4175 = vmatmul.mubr.msk.f32.vlgmr.msra.gmra.mxu0 %vm161_vm1, %v87_v5  ;;  %4182 = vmatmul.mubr.msk.f32.vlgmr.msra.gmra.mxu1 %vm161_vm1, %v87_v5  ;;  %v1363_v36 = vld [vmem:[%s5320_s6 + $0x18] sm:$0xff]  ;;  %v1360_v37 = vld [vmem:[%s5320_s6] sm:$0xff]  ;;  %v1362_v38 = vld [vmem:[%s5320_s6 + $0x10] sm:$0xff] }
  0x40   :  { %4184 = vmatprep.subr.mxu0 %v4647_v0  ;;  %4191 = vmatprep.subr.mxu1 %v4647_v0  ;;  %v1365_v39 = vld [vmem:[%s5320_s6 + $0x28] sm:$0xff]  ;;  %v1367_v40 = vld [vmem:[%s5320_s6 + $0x38] sm:$0xff]  ;;  %v1364_v41 = vld [vmem:[%s5320_s6 + $0x20] sm:$0xff] }
  0x41   :  { %4185 = vmatpush3.msra.mxu0 %v98_v10  ;;  %4192 = vmatpush3.msra.mxu1 %v100_v11  ;;  %v1366_v42 = vld [vmem:[%s5320_s6 + $0x30] sm:$0xff]  ;;  %v1369_v43 = vld [vmem:[%s5320_s6 + $0x48] sm:$0xff]  ;;  %v1371_v44 = vld [vmem:[%s5320_s6 + $0x58] sm:$0xff] }
  0x42   :  { %4186 = vmatprep.subr.mxu0 %v4647_v0  ;;  %4193 = vmatprep.subr.mxu1 %v4647_v0  ;;  %v1368_v45 = vld [vmem:[%s5320_s6 + $0x40] sm:$0xff]  ;;  %v1370_v46 = vld [vmem:[%s5320_s6 + $0x50] sm:$0xff]  ;;  %v1373_v47 = vld [vmem:[%s5320_s6 + $0x68] sm:$0xff] }
  0x43   :  { %4187 = vmatpush3.msra.mxu0 %v97_v12  ;;  %4188 = vmatprep.mubr.msk.f32.mxu0 %vm4648_vm0, %v4647_v0  ;;  %v1375_v48 = vld [vmem:[%s5320_s6 + $0x78] sm:$0xff]  ;;  %v1372_v49 = vld [vmem:[%s5320_s6 + $0x60] sm:$0xff]  ;;  %v1374_v50 = vld [vmem:[%s5320_s6 + $0x70] sm:$0xff] }
  0x44   :  { %4194 = vmatpush3.msra.mxu1 %v99_v13  ;;  %4195 = vmatprep.mubr.msk.f32.mxu1 %vm4648_vm0, %v4647_v0  ;;  %v3947_v4 = vld [vmem:[#allocation8] ss:$0 sm:$0xff]  ;;  %v3931_v8 = vld [vmem:[#allocation7] ss:$0 sm:$0xff]  ;;  %v3932_v9 = vld [vmem:[#allocation7 + $0x1] ss:$0 sm:$0xff] }
  0x45   :  { %4189 = vmatmul.mubr.msk.f32.vlgmr.msra.gmra.mxu0 %vm161_vm1, %v87_v5  ;;  %4196 = vmatmul.mubr.msk.f32.vlgmr.msra.gmra.mxu1 %vm161_vm1, %v87_v5 }
  0x46   :  { %4198 = vmatprep.subr.mxu0 %v4647_v0  ;;  %4205 = vmatprep.subr.mxu1 %v4647_v0 }
  0x47   :  { %4199 = vmatpush3.msra.mxu0 %v102_v14  ;;  %4206 = vmatpush3.msra.mxu1 %v104_v15 }
  0x48   :  { %4200 = vmatprep.subr.mxu0 %v4647_v0  ;;  %4207 = vmatprep.subr.mxu1 %v4647_v0 }
  0x49   :  { %4201 = vmatpush3.msra.mxu0 %v101_v16  ;;  %4202 = vmatprep.mubr.msk.f32.mxu0 %vm4648_vm0, %v4647_v0  ;;  %v3949_v16 = vld [vmem:[#allocation8 + $0x2] ss:$0 sm:$0xff] }
  0x4a   :  { %4208 = vmatpush3.msra.mxu1 %v103_v17  ;;  %4209 = vmatprep.mubr.msk.f32.mxu1 %vm4648_vm0, %v4647_v0  ;;  %v3950_v17 = vld [vmem:[#allocation8 + $0x3] ss:$0 sm:$0xff] }
  0x4b   :  { %4203 = vmatmul.mubr.msk.f32.vlgmr.msra.gmra.mxu0 %vm161_vm1, %v87_v5  ;;  %4210 = vmatmul.mubr.msk.f32.vlgmr.msra.gmra.mxu1 %vm161_vm1, %v87_v5  ;;  %v3948_v5 = vld [vmem:[#allocation8 + $0x1] ss:$0 sm:$0xff] }
  0x4c   :  { %4212 = vmatprep.subr.mxu0 %v4647_v0  ;;  %4219 = vmatprep.subr.mxu1 %v4647_v0 }
  0x4d   :  { %4213 = vmatpush3.msra.mxu0 %v726_v18  ;;  %4220 = vmatpush3.msra.mxu1 %v728_v19 }
  0x4e   :  { %4214 = vmatprep.subr.mxu0 %v4647_v0  ;;  %4221 = vmatprep.subr.mxu1 %v4647_v0 }
  0x4f   :  { %4215 = vmatpush3.msra.mxu0 %v725_v20  ;;  %4216 = vmatprep.mubr.msk.f32.mxu0 %vm4648_vm0, %v4647_v0  ;;  %v3933_v20 = vld [vmem:[#allocation7 + $0x2] ss:$0 sm:$0xff] }
  0x50   :  { %4222 = vmatpush3.msra.mxu1 %v727_v21  ;;  %4223 = vmatprep.mubr.msk.f32.mxu1 %vm4648_vm0, %v4647_v0  ;;  %v3934_v21 = vld [vmem:[#allocation7 + $0x3] ss:$0 sm:$0xff] }
  0x51   :  { %4217 = vmatmul.mubr.msk.f32.vlgmr.msra.gmra.mxu0 %vm161_vm1, %v4821_v22  ;;  %4224 = vmatmul.mubr.msk.f32.vlgmr.msra.gmra.mxu1 %vm161_vm1, %v4821_v22 }
  0x52   :  { %4226 = vmatprep.subr.mxu0 %v4647_v0  ;;  %4233 = vmatprep.subr.mxu1 %v4647_v0 }
  0x53   :  { %4227 = vmatpush3.msra.mxu0 %v730_v23  ;;  %4234 = vmatpush3.msra.mxu1 %v732_v24 }
  0x54   :  { %4228 = vmatprep.subr.mxu0 %v4647_v0  ;;  %4235 = vmatprep.subr.mxu1 %v4647_v0 }
  0x55   :  { %4229 = vmatpush3.msra.mxu0 %v729_v25  ;;  %4230 = vmatprep.mubr.msk.f32.mxu0 %vm4648_vm0, %v4647_v0 }
  0x56   :  { %4236 = vmatpush3.msra.mxu1 %v731_v26  ;;  %4237 = vmatprep.mubr.msk.f32.mxu1 %vm4648_vm0, %v4647_v0 }
  0x57   :  { %4231 = vmatmul.mubr.msk.f32.vlgmr.msra.gmra.mxu0 %vm161_vm1, %v4821_v22  ;;  %4238 = vmatmul.mubr.msk.f32.vlgmr.msra.gmra.mxu1 %vm161_vm1, %v4821_v22 }
  0x58   :  { %4240 = vmatprep.subr.mxu0 %v4647_v0  ;;  %4247 = vmatprep.subr.mxu1 %v4647_v0 }
  0x59   :  { %4241 = vmatpush3.msra.mxu0 %v734_v27  ;;  %4248 = vmatpush3.msra.mxu1 %v736_v28  ;;  %v3951_v28 = vld [vmem:[#allocation8 + $0x4] ss:$0 sm:$0xff] }
  0x5a   :  { %4242 = vmatprep.subr.mxu0 %v4647_v0  ;;  %4249 = vmatprep.subr.mxu1 %v4647_v0 }
  0x5b   :  { %4243 = vmatpush3.msra.mxu0 %v733_v29  ;;  %4244 = vmatprep.mubr.msk.f32.mxu0 %vm4648_vm0, %v4647_v0  ;;  %v3952_v29 = vld [vmem:[#allocation8 + $0x5] ss:$0 sm:$0xff] }
  0x5c   :  { %4250 = vmatpush3.msra.mxu1 %v735_v30  ;;  %4251 = vmatprep.mubr.msk.f32.mxu1 %vm4648_vm0, %v4647_v0 }
  0x5d   :  { %4245 = vmatmul.mubr.msk.f32.vlgmr.msra.gmra.mxu0 %vm161_vm1, %v4821_v22  ;;  %4252 = vmatmul.mubr.msk.f32.vlgmr.msra.gmra.mxu1 %vm161_vm1, %v4821_v22 }
  0x5e   :  { %4254 = vmatprep.subr.mxu0 %v4647_v0  ;;  %4261 = vmatprep.subr.mxu1 %v4647_v0 }
  0x5f   :  { %4255 = vmatpush3.msra.mxu0 %v738_v31  ;;  %4262 = vmatpush3.msra.mxu1 %v740_v32  ;;  %v3935_v32 = vld [vmem:[#allocation7 + $0x4] ss:$0 sm:$0xff] }
  0x60   :  { %4256 = vmatprep.subr.mxu0 %v4647_v0  ;;  %4263 = vmatprep.subr.mxu1 %v4647_v0 }
  0x61   :  { %4257 = vmatpush3.msra.mxu0 %v737_v33  ;;  %4258 = vmatprep.mubr.msk.f32.mxu0 %vm4648_vm0, %v4647_v0  ;;  %v3936_v33 = vld [vmem:[#allocation7 + $0x5] ss:$0 sm:$0xff] }
  0x62   :  { %4264 = vmatpush3.msra.mxu1 %v739_v34  ;;  %4265 = vmatprep.mubr.msk.f32.mxu1 %vm4648_vm0, %v4647_v0 }
  0x63   :  { %4259 = vmatmul.mubr.msk.f32.vlgmr.msra.gmra.mxu0 %vm161_vm1, %v4821_v22  ;;  %4266 = vmatmul.mubr.msk.f32.vlgmr.msra.gmra.mxu1 %vm161_vm1, %v4821_v22 }
  0x64   :  { %4268 = vmatprep.subr.mxu0 %v4647_v0  ;;  %4275 = vmatprep.subr.mxu1 %v4647_v0 }
  0x65   :  { %4272 = vmatprep.mubr.msk.f32.mxu0 %vm4648_vm0, %v4647_v0  ;;  %4279 = vmatprep.mubr.msk.f32.mxu1 %vm4648_vm0, %v4647_v0 }
  0x66   :  { %4269 = vmatpush3.msra.mxu0 %v1361_v35  ;;  %4276 = vmatpush3.msra.mxu1 %v1363_v36 }
  0x67   :  { %4270 = vmatprep.subr.mxu0 %v4647_v0  ;;  %4277 = vmatprep.subr.mxu1 %v4647_v0 }
  0x68   :  { %4271 = vmatpush3.msra.mxu0 %v1360_v37  ;;  %4278 = vmatpush3.msra.mxu1 %v1362_v38 }
  0x69   :  { %4273 = vmatmul.mubr.msk.f32.vlgmr.msra.gmra.mxu0 %vm161_vm1, %v4821_v22  ;;  %4282 = vmatprep.subr.mxu0 %v4647_v0 }
  0x6a   :  { %4280 = vmatmul.mubr.msk.f32.vlgmr.msra.gmra.mxu1 %vm161_vm1, %v4821_v22  ;;  %4283 = vmatpush3.msra.mxu0 %v1365_v39 }
  0x6b   :  { %4289 = vmatprep.subr.mxu1 %v4647_v0  ;;  %4284 = vmatprep.subr.mxu0 %v4647_v0 }
  0x6c   :  { %4290 = vmatpush3.msra.mxu1 %v1367_v40  ;;  %4286 = vmatprep.mubr.msk.f32.mxu0 %vm4648_vm0, %v4647_v0  ;;  %v3953_v40 = vld [vmem:[#allocation8 + $0x6] ss:$0 sm:$0xff] }
  0x6d   :  { %4291 = vmatprep.subr.mxu1 %v4647_v0  ;;  %4293 = vmatprep.mubr.msk.f32.mxu1 %vm4648_vm0, %v4647_v0 }
  0x6e   :  { %4285 = vmatpush3.msra.mxu0 %v1364_v41  ;;  %4292 = vmatpush3.msra.mxu1 %v1366_v42  ;;  %v3954_v41 = vld [vmem:[#allocation8 + $0x7] ss:$0 sm:$0xff] }
  0x6f   :  { %4287 = vmatmul.mubr.msk.f32.vlgmr.msra.gmra.mxu0 %vm161_vm1, %v4821_v22  ;;  %4296 = vmatprep.subr.mxu0 %v4647_v0 }
  0x70   :  { %4294 = vmatmul.mubr.msk.f32.vlgmr.msra.gmra.mxu1 %vm161_vm1, %v4821_v22  ;;  %4297 = vmatpush3.msra.mxu0 %v1369_v43 }
  0x71   :  { %4303 = vmatprep.subr.mxu1 %v4647_v0  ;;  %4298 = vmatprep.subr.mxu0 %v4647_v0 }
  0x72   :  { %4304 = vmatpush3.msra.mxu1 %v1371_v44  ;;  %4300 = vmatprep.mubr.msk.f32.mxu0 %vm4648_vm0, %v4647_v0  ;;  %v3937_v44 = vld [vmem:[#allocation7 + $0x6] ss:$0 sm:$0xff] }
  0x73   :  { %4305 = vmatprep.subr.mxu1 %v4647_v0  ;;  %4307 = vmatprep.mubr.msk.f32.mxu1 %vm4648_vm0, %v4647_v0 }
  0x74   :  { %4299 = vmatpush3.msra.mxu0 %v1368_v45  ;;  %4306 = vmatpush3.msra.mxu1 %v1370_v46  ;;  %v3938_v45 = vld [vmem:[#allocation7 + $0x7] ss:$0 sm:$0xff] }
  0x75   :  { %4301 = vmatmul.mubr.msk.f32.vlgmr.msra.gmra.mxu0 %vm161_vm1, %v4821_v22  ;;  %4310 = vmatprep.subr.mxu0 %v4647_v0 }
  0x76   :  { %4308 = vmatmul.mubr.msk.f32.vlgmr.msra.gmra.mxu1 %vm161_vm1, %v4821_v22  ;;  %4311 = vmatpush3.msra.mxu0 %v1373_v47 }
  0x77   :  { %4317 = vmatprep.subr.mxu1 %v4647_v0  ;;  %4312 = vmatprep.subr.mxu0 %v4647_v0 }
  0x78   :  { %4318 = vmatpush3.msra.mxu1 %v1375_v48  ;;  %4314 = vmatprep.mubr.msk.f32.mxu0 %vm4648_vm0, %v4647_v0 }
  0x79   :  { %4319 = vmatprep.subr.mxu1 %v4647_v0  ;;  %4321 = vmatprep.mubr.msk.f32.mxu1 %vm4648_vm0, %v4647_v0 }
  0x7a   :  { %4313 = vmatpush3.msra.mxu0 %v1372_v49  ;;  %4320 = vmatpush3.msra.mxu1 %v1374_v50 }
  0x7b   :  { %4315 = vmatmul.mubr.msk.f32.vlgmr.msra.gmra.mxu0 %vm161_vm1, %v4821_v22  ;;  %4322 = vmatmul.mubr.msk.f32.vlgmr.msra.gmra.mxu1 %vm161_vm1, %v4821_v22 }
  0x7c   :  { %4324 = vmatprep.subr.mxu0 %v4647_v0  ;;  %4329 = vmatprep.subr.mxu1 %v4647_v0 }
  0x7d   :  { %4326 = vmatprep.mubr.msk.f32.mxu0 %vm4648_vm0, %v4647_v0  ;;  %4331 = vmatprep.mubr.msk.f32.mxu1 %vm4648_vm0, %v4647_v0 }
  0xf9   :  { %v231_v51 = vpop.f32.mrf.mxu0  ;;  %v301_v52 = vpop.f32.mrf.mxu1 }
  0xfa   :  { %v232_v14 = vadd.f32 %v3931_v8, %v231_v51  ;;  %v302_v15 = vadd.f32 %v3932_v9, %v301_v52  ;;  %v3963_v52 = vld [vmem:[%s5321_s7] ss:$0 sm:$0xff] }
  0xfb   :  { %v4162_v53 = vpop.f32.mrf.mxu0  ;;  %v4169_v54 = vpop.f32.mrf.mxu1 }
  0xfc   :  { %v3964_v53 = vld [vmem:[%s5321_s7 + $0x1] ss:$0 sm:$0xff] }
  0xff   :  { %v371_v55 = vpop.f32.mrf.mxu0  ;;  %v441_v56 = vpop.f32.mrf.mxu1 }
 0x100   :  { %v372_v26 = vadd.f32 %v3933_v20, %v371_v55  ;;  %v442_v27 = vadd.f32 %v3934_v21, %v441_v56 }
 0x101   :  { %v4176_v57 = vpop.f32.mrf.mxu0  ;;  %v4183_v58 = vpop.f32.mrf.mxu1 }
 0x105   :  { %v511_v59 = vpop.f32.mrf.mxu0  ;;  %v581_v60 = vpop.f32.mrf.mxu1 }
 0x106   :  { %v512_v38 = vadd.f32 %v3935_v32, %v511_v59  ;;  %v582_v39 = vadd.f32 %v3936_v33, %v581_v60 }
 0x107   :  { %v4190_v61 = vpop.f32.mrf.mxu0  ;;  %v4197_v62 = vpop.f32.mrf.mxu1 }
 0x10b   :  { %v5005_v63 = vpop.f32.mrf.mxu0  ;;  %v5007_v1 = vpop.f32.mrf.mxu1 }
 0x10c   :  { %v652_v50 = vadd.f32 %v3937_v44, %v5005_v63  ;;  %v722_v51 = vadd.f32 %v3938_v45, %v5007_v1 }
 0x10d   :  { %v4204_v2 = vpop.f32.mrf.mxu0  ;;  %v4211_v3 = vpop.f32.mrf.mxu1 }
 0x111   :  { %v866_v6 = vpop.f32.mrf.mxu0  ;;  %v936_v7 = vpop.f32.mrf.mxu1 }
 0x112   :  { %v867_v10 = vadd.f32 %v3947_v4, %v866_v6  ;;  %v937_v11 = vadd.f32 %v3948_v5, %v936_v7 }
 0x113   :  { %v4218_v12 = vpop.f32.mrf.mxu0  ;;  %v4225_v13 = vpop.f32.mrf.mxu1 }
 0x114   :  { %4325 = vmatpush3.xpose.msk.msra.mxu0 %vm1992_vm2, %v867_v10  ;;  %4330 = vmatpush3.xpose.msk.msra.mxu1 %vm1992_vm2, %v937_v11 }
 0x115   :  { %4334 = vmatprep.subr.mxu0 %v4647_v0  ;;  %4339 = vmatprep.subr.mxu1 %v4647_v0 }
 0x117   :  { %v1006_v18 = vpop.f32.mrf.mxu0  ;;  %v1076_v19 = vpop.f32.mrf.mxu1  ;;  %4327 = vmatmul.mubr.msk.f32.vlgmr.msra.gmra.mxu0 %vm1992_vm2, %v232_v14  ;;  %4332 = vmatmul.mubr.msk.f32.vlgmr.msra.gmra.mxu1 %vm1992_vm2, %v302_v15 }
 0x118   :  { %v1007_v22 = vadd.f32 %v3949_v16, %v1006_v18  ;;  %v1077_v23 = vadd.f32 %v3950_v17, %v1076_v19  ;;  %4336 = vmatprep.mubr.msk.f32.mxu0 %vm4648_vm0, %v4647_v0  ;;  %4341 = vmatprep.mubr.msk.f32.mxu1 %vm4648_vm0, %v4647_v0 }
 0x119   :  { %v4232_v24 = vpop.f32.mrf.mxu0  ;;  %v4239_v25 = vpop.f32.mrf.mxu1 }
 0x11a   :  { %4335 = vmatpush3.xpose.msk.msra.mxu0 %vm1992_vm2, %v1007_v22  ;;  %4340 = vmatpush3.xpose.msk.msra.mxu1 %vm1992_vm2, %v1077_v23 }
 0x11b   :  { %4344 = vmatprep.subr.mxu0 %v4647_v0  ;;  %4349 = vmatprep.subr.mxu1 %v4647_v0 }
 0x11d   :  { %v1146_v30 = vpop.f32.mrf.mxu0  ;;  %v1216_v31 = vpop.f32.mrf.mxu1  ;;  %4337 = vmatmul.mubr.msk.f32.vlgmr.msra.gmra.mxu0 %vm1992_vm2, %v372_v26  ;;  %4342 = vmatmul.mubr.msk.f32.vlgmr.msra.gmra.mxu1 %vm1992_vm2, %v442_v27 }
 0x11e   :  { %v1147_v34 = vadd.f32 %v3951_v28, %v1146_v30  ;;  %v1217_v35 = vadd.f32 %v3952_v29, %v1216_v31  ;;  %4346 = vmatprep.mubr.msk.f32.mxu0 %vm4648_vm0, %v4647_v0  ;;  %4351 = vmatprep.mubr.msk.f32.mxu1 %vm4648_vm0, %v4647_v0 }
 0x11f   :  { %v4246_v36 = vpop.f32.mrf.mxu0  ;;  %v4253_v37 = vpop.f32.mrf.mxu1 }
 0x120   :  { %4345 = vmatpush3.xpose.msk.msra.mxu0 %vm1992_vm2, %v1147_v34  ;;  %4350 = vmatpush3.xpose.msk.msra.mxu1 %vm1992_vm2, %v1217_v35 }
 0x121   :  { %4354 = vmatprep.subr.mxu0 %v4647_v0  ;;  %4359 = vmatprep.subr.mxu1 %v4647_v0 }
 0x123   :  { %v1286_v42 = vpop.f32.mrf.mxu0  ;;  %v1356_v43 = vpop.f32.mrf.mxu1  ;;  %4347 = vmatmul.mubr.msk.f32.vlgmr.msra.gmra.mxu0 %vm1992_vm2, %v512_v38  ;;  %4352 = vmatmul.mubr.msk.f32.vlgmr.msra.gmra.mxu1 %vm1992_vm2, %v582_v39 }
 0x124   :  { %v1287_v46 = vadd.f32 %v3953_v40, %v1286_v42  ;;  %v1357_v47 = vadd.f32 %v3954_v41, %v1356_v43  ;;  %4356 = vmatprep.mubr.msk.f32.mxu0 %vm4648_vm0, %v4647_v0  ;;  %4361 = vmatprep.mubr.msk.f32.mxu1 %vm4648_vm0, %v4647_v0 }
 0x125   :  { %v4260_v48 = vpop.f32.mrf.mxu0  ;;  %v4267_v49 = vpop.f32.mrf.mxu1 }
 0x126   :  { %4355 = vmatpush3.xpose.msk.msra.mxu0 %vm1992_vm2, %v1287_v46  ;;  %4360 = vmatpush3.xpose.msk.msra.mxu1 %vm1992_vm2, %v1357_v47 }
 0x127   :  { %4364 = vmatprep.subr.mxu0 %v4647_v0  ;;  %4369 = vmatprep.subr.mxu1 %v4647_v0 }
 0x129   :  { %4357 = vmatmul.mubr.msk.f32.vlgmr.msra.gmra.mxu0 %vm1992_vm2, %v652_v50  ;;  %4362 = vmatmul.mubr.msk.f32.vlgmr.msra.gmra.mxu1 %vm1992_vm2, %v722_v51  ;;  %v1498_v54 = vpop.f32.mrf.mxu0 }
 0x12a   :  { %4366 = vmatprep.mubr.msk.f32.mxu0 %vm4648_vm0, %v4647_v0  ;;  %4371 = vmatprep.mubr.msk.f32.mxu1 %vm4648_vm0, %v4647_v0  ;;  %v1499_v55 = vadd.f32 %v3963_v52, %v1498_v54  ;;  %v1568_v56 = vpop.f32.mrf.mxu1 }
 0x12b   :  { %v1569_v57 = vadd.f32 %v3964_v53, %v1568_v56  ;;  %v4274_v58 = vpop.f32.mrf.mxu0 }
 0x12c   :  { %v4281_v59 = vpop.f32.mrf.mxu1  ;;  %4365 = vmatpush3.msra.mxu0 %v1499_v55 }
 0x12d   :  { %4370 = vmatpush3.msra.mxu1 %v1569_v57  ;;  %4374 = vmatprep.subr.mxu0 %v4647_v0 }
 0x12e   :  { %4379 = vmatprep.subr.mxu1 %v4647_v0 }
 0x12f   :  { %v5059_v60 = vpop.f32.mrf.mxu0 }
 0x130   :  { %v5061_v61 = vpop.f32.mrf.mxu1 }
 0x131   :  { %v4288_v62 = vpop.f32.mrf.mxu0 }
 0x132   :  { %v4295_v63 = vpop.f32.mrf.mxu1 }
 0x135   :  { %v5063_v1 = vpop.f32.mrf.mxu0 }
 0x136   :  { %v5065_v2 = vpop.f32.mrf.mxu1 }
 0x137   :  { %v4302_v3 = vpop.f32.mrf.mxu0 }
 0x138   :  { %v4309_v4 = vpop.f32.mrf.mxu1 }
 0x13b   :  { %v5067_v5 = vpop.f32.mrf.mxu0  ;;  %v5069_v6 = vpop.f32.mrf.mxu1 }
 0x13d   :  { %v4316_v7 = vpop.f32.mrf.mxu0  ;;  %v4323_v8 = vpop.f32.mrf.mxu1 }
 0x1d7   :  { %v2065_v9 = vpop.f32.mrf.mxu0  ;;  %v2141_v10 = vpop.f32.mrf.mxu1 }
 0x1d8   :  { %v2602_v11 = vsel %vm2601_vm3, %v2065_v9, -inf  ;;  %v2605_v14 = vsel %vm2601_vm3, %v2141_v10, -inf }
 0x1d9   :  { %v4333_v12 = vpop.f32.mrf.mxu1  ;;  %2603 = vmax.xlane.f32.xlu0 %v2602_v11  ;;  %v4328_v13 = vpop.f32.mrf.mxu0 }
 0x1dd   :  { %v2217_v15 = vpop.f32.mrf.mxu0  ;;  %v2293_v16 = vpop.f32.mrf.mxu1  ;;  %2606 = vmax.xlane.f32.xlu0 %v2605_v14 }
 0x1de   :  { %v2608_v17 = vsel %vm2601_vm3, %v2217_v15, -inf  ;;  %v2611_v20 = vsel %vm2601_vm3, %v2293_v16, -inf }
 0x1df   :  { %v4343_v18 = vpop.f32.mrf.mxu1  ;;  %2609 = vmax.xlane.f32.xlu1 %v2608_v17  ;;  %v4338_v19 = vpop.f32.mrf.mxu0 }
 0x1e3   :  { %v2369_v21 = vpop.f32.mrf.mxu0  ;;  %v2445_v22 = vpop.f32.mrf.mxu1  ;;  %2612 = vmax.xlane.f32.xlu1 %v2611_v20 }
 0x1e4   :  { %v2614_v23 = vsel %vm2601_vm3, %v2369_v21, -inf  ;;  %v2617_v26 = vsel %vm2601_vm3, %v2445_v22, -inf }
 0x1e5   :  { %v4353_v24 = vpop.f32.mrf.mxu1  ;;  %2615 = vmax.xlane.f32.xlu0 %v2614_v23  ;;  %v4348_v25 = vpop.f32.mrf.mxu0 }
 0x1e7   :  { %2618 = vmax.xlane.f32.xlu1 %v2617_v26  ;;  %v3966_v26 = vld [vmem:[%s5321_s7 + $0x3] ss:$0 sm:$0xff] }
 0x1e9   :  { %v2521_v27 = vpop.f32.mrf.mxu0  ;;  %v2597_v28 = vpop.f32.mrf.mxu1 }
 0x1ea   :  { %v2620_v29 = vsel %vm2601_vm3, %v2521_v27, -inf  ;;  %v2623_v30 = vsel %vm2601_vm3, %v2597_v28, -inf }
 0x1eb   :  { %v4363_v31 = vpop.f32.mrf.mxu1  ;;  %2621 = vmax.xlane.f32.xlu0 %v2620_v29  ;;  %v4358_v32 = vpop.f32.mrf.mxu0  ;;  %2624 = vmax.xlane.f32.xlu1 %v2623_v30  ;;  %v3967_v29 = vld [vmem:[%s5321_s7 + $0x4] ss:$0 sm:$0xff] }
 0x1ec   :  { %v1709_v32 = vadd.f32 %v3966_v26, %v5061_v61  ;;  %v3969_v61 = vld [vmem:[%s5321_s7 + $0x6] ss:$0 sm:$0xff] }
 0x262   :  { %v2604_v33 = vpop.xlane.xlu0 %2603 }
 0x263   :  { %v2626_v34 = vsub.f32 %v2065_v9, %v2604_v33 }
 0x265   :  { %v2634_v35 = vmul.f32 1.442695, %v2626_v34  ;;  %v1779_v34 = vadd.f32 %v3967_v29, %v5063_v1  ;;  %v3300_v29 = vld [vmem:[%s5322_s8 + $0xd0] sm:$0xff] }
 0x266   :  { %v2607_v36 = vpop.xlane.xlu0 %2606 }
 0x267   :  { %4501 = vpow2.f32 %v2634_v35  ;;  %v2627_v37 = vsub.f32 %v2141_v10, %v2607_v36  ;;  %v3968_v35 = vld [vmem:[%s5321_s7 + $0x5] ss:$0 sm:$0xff] }
 0x268   :  { %v2610_v38 = vpop.xlane.xlu1 %2609 }
 0x269   :  { %v2636_v39 = vmul.f32 1.442695, %v2627_v37  ;;  %v2628_v40 = vsub.f32 %v2217_v15, %v2610_v38  ;;  %v1849_v38 = vadd.f32 %v3968_v35, %v5065_v2  ;;  %v3302_v35 = vld [vmem:[%s5322_s8 + $0xe0] sm:$0xff] }
 0x26b   :  { %4503 = vpow2.f32 %v2636_v39  ;;  %v2638_v41 = vmul.f32 1.442695, %v2628_v40  ;;  %v3970_v39 = vld [vmem:[%s5321_s7 + $0x7] ss:$0 sm:$0xff] }
 0x26c   :  { %v2613_v42 = vpop.xlane.xlu1 %2612 }
 0x26d   :  { %4505 = vpow2.f32 %v2638_v41  ;;  %v2629_v43 = vsub.f32 %v2293_v16, %v2613_v42  ;;  %v1919_v42 = vadd.f32 %v3969_v61, %v5067_v5 }
 0x26e   :  { %v2616_v44 = vpop.xlane.xlu0 %2615 }
 0x26f   :  { %v2640_v45 = vmul.f32 1.442695, %v2629_v43  ;;  %v2630_v46 = vsub.f32 %v2369_v21, %v2616_v44  ;;  %v3965_v21 = vld [vmem:[%s5321_s7 + $0x2] ss:$0 sm:$0xff]  ;;  %v1989_v43 = vadd.f32 %v3970_v39, %v5069_v6  ;;  %v3277_v6 = vld [vmem:[%s5322_s8 + $0x18] sm:$0xff] }
 0x270   :  { %v2619_v47 = vpop.xlane.xlu1 %2618  ;;  %v1639_v25 = vadd.f32 %v3965_v21, %v5059_v60  ;;  %v3296_v21 = vld [vmem:[%s5322_s8 + $0xb0] sm:$0xff] }
 0x271   :  { %4507 = vpow2.f32 %v2640_v45  ;;  %v2642_v48 = vmul.f32 1.442695, %v2630_v46  ;;  %v2631_v49 = vsub.f32 %v2445_v22, %v2619_v47  ;;  %v3281_v47 = vld [vmem:[%s5322_s8 + $0x38] sm:$0xff] }
 0x273   :  { %4509 = vpow2.f32 %v2642_v48  ;;  %v2644_v50 = vmul.f32 1.442695, %v2631_v49  ;;  %v3276_v48 = vld [vmem:[%s5322_s8 + $0x10] sm:$0xff] }
 0x274   :  { %v4502_v51 = vpop.eup %4501  ;;  %v2622_v52 = vpop.xlane.xlu0 %2621  ;;  %v3280_v49 = vld [vmem:[%s5322_s8 + $0x30] sm:$0xff] }
 0x275   :  { %v2625_v53 = vpop.xlane.xlu1 %2624  ;;  %4511 = vpow2.f32 %v2644_v50  ;;  %v2632_v54 = vsub.f32 %v2521_v27, %v2622_v52  ;;  %v2650_v56 = vsel %vm2601_vm3, %v4502_v51, 0.0  ;;  %v3275_v50 = vld [vmem:[%s5322_s8 + $0x8] sm:$0xff] }
 0x276   :  { %v2633_v55 = vsub.f32 %v2597_v28, %v2625_v53  ;;  %2651 = vadd.xlane.f32.xlu0 %v2650_v56  ;;  %v3279_v52 = vld [vmem:[%s5322_s8 + $0x28] sm:$0xff]  ;;  %v3278_v53 = vld [vmem:[%s5322_s8 + $0x20] sm:$0xff]  ;;  %v3284_v56 = vld [vmem:[%s5322_s8 + $0x50] sm:$0xff] }
 0x277   :  { %v2646_v57 = vmul.f32 1.442695, %v2632_v54  ;;  %v3285_v54 = vld [vmem:[%s5322_s8 + $0x58] sm:$0xff] }
 0x278   :  { %v2648_v58 = vmul.f32 1.442695, %v2633_v55  ;;  %v4504_v59 = vpop.eup %4503 }
 0x279   :  { %4513 = vpow2.f32 %v2646_v57  ;;  %v2653_v62 = vsel %vm2601_vm3, %v4504_v59, 0.0 }
 0x27a   :  { %v4506_v63 = vpop.eup %4505  ;;  %4515 = vpow2.f32 %v2648_v58  ;;  %2654 = vadd.xlane.f32.xlu1 %v2653_v62  ;;  %v3283_v58 = vld [vmem:[%s5322_s8 + $0x48] sm:$0xff] }
 0x27b   :  { %v2656_v3 = vsel %vm2601_vm3, %v4506_v63, 0.0 }
 0x27c   :  { %2657 = vadd.xlane.f32.xlu0 %v2656_v3  ;;  %v3288_v3 = vld [vmem:[%s5322_s8 + $0x70] sm:$0xff] }
 0x27e   :  { %v4508_v4 = vpop.eup %4507 }
 0x27f   :  { %v2659_v7 = vsel %vm2601_vm3, %v4508_v4, 0.0 }
 0x280   :  { %v4510_v8 = vpop.eup %4509  ;;  %2660 = vadd.xlane.f32.xlu1 %v2659_v7 }
 0x281   :  { %v2662_v9 = vsel %vm2601_vm3, %v4510_v8, 0.0 }
 0x282   :  { %v5084_v10 = vpop.eup %4511  ;;  %2663 = vadd.xlane.f32.xlu0 %v2662_v9 }
 0x283   :  { %v2665_v11 = vsel %vm2601_vm3, %v5084_v10, 0.0 }
 0x284   :  { %2666 = vadd.xlane.f32.xlu1 %v2665_v11  ;;  %v3286_v11 = vld [vmem:[%s5322_s8 + $0x60] sm:$0xff] }
 0x286   :  { %v5088_v12 = vpop.eup %4513 }
 0x287   :  { %v5090_v13 = vpop.eup %4515  ;;  %v2668_v14 = vsel %vm2601_vm3, %v5088_v12, 0.0 }
 0x288   :  { %2669 = vadd.xlane.f32.xlu0 %v2668_v14  ;;  %v2671_v15 = vsel %vm2601_vm3, %v5090_v13, 0.0 }
 0x289   :  { %2672 = vadd.xlane.f32.xlu1 %v2671_v15 }
 0x2ff   :  { %v2652_v16 = vpop.xlane.xlu0 %2651 }
 0x300   :  { %4517 = vrcp.f32 %v2652_v16  ;;  %v3291_v16 = vld [vmem:[%s5322_s8 + $0x88] sm:$0xff] }
 0x303   :  { %v2655_v17 = vpop.xlane.xlu1 %2654 }
 0x304   :  { %4519 = vrcp.f32 %v2655_v17  ;;  %v3297_v17 = vld [vmem:[%s5322_s8 + $0xb8] sm:$0xff] }
 0x305   :  { %v2658_v18 = vpop.xlane.xlu0 %2657 }
 0x306   :  { %4521 = vrcp.f32 %v2658_v18 }
 0x309   :  { %v2661_v19 = vpop.xlane.xlu1 %2660 }
 0x30a   :  { %4523 = vrcp.f32 %v2661_v19 }
 0x30b   :  { %v2664_v20 = vpop.xlane.xlu0 %2663 }
 0x30c   :  { %4525 = vrcp.f32 %v2664_v20  ;;  %v3290_v20 = vld [vmem:[%s5322_s8 + $0x80] sm:$0xff] }
 0x30d   :  { %v4518_v22 = vpop.eup %4517  ;;  %v2667_v23 = vpop.xlane.xlu1 %2666 }
 0x30e   :  { %4527 = vrcp.f32 %v2667_v23  ;;  %v2675_v24 = vmul.f32 %v4518_v22, %v4502_v51  ;;  %v3274_v51 = vld [vmem:[%s5322_s8] sm:$0xff]  ;;  %v3295_v23 = vld [vmem:[%s5322_s8 + $0xa8] sm:$0xff] }
 0x310   :  { %4367 = vmatmul.mubr.msk.f32.vlgmr.msra.gmra.mxu0 %vm2601_vm3, %v2675_v24 }
 0x311   :  { %v4520_v27 = vpop.eup %4519  ;;  %v2670_v28 = vpop.xlane.xlu0 %2669  ;;  %4375 = vmatpush3.msra.mxu0 %v1639_v25  ;;  %4376 = vmatprep.mubr.msk.f32.mxu0 %vm4648_vm0, %v4647_v0  ;;  %v3301_v25 = vld [vmem:[%s5322_s8 + $0xd8] sm:$0xff] }
 0x312   :  { %4529 = vrcp.f32 %v2670_v28  ;;  %v2673_v30 = vpop.xlane.xlu1 %2672  ;;  %4384 = vmatprep.subr.mxu0 %v4647_v0  ;;  %v2677_v60 = vmul.f32 %v4520_v27, %v4504_v59  ;;  %v3289_v59 = vld [vmem:[%s5322_s8 + $0x78] sm:$0xff]  ;;  %v3294_v27 = vld [vmem:[%s5322_s8 + $0xa0] sm:$0xff] }
 0x313   :  { %v4522_v31 = vpop.eup %4521  ;;  %4531 = vrcp.f32 %v2673_v30 }
 0x314   :  { %4372 = vmatmul.mubr.msk.f32.vlgmr.msra.gmra.mxu1 %vm2601_vm3, %v2677_v60  ;;  %v2679_v33 = vmul.f32 %v4522_v31, %v4506_v63  ;;  %v3282_v63 = vld [vmem:[%s5322_s8 + $0x40] sm:$0xff]  ;;  %v3299_v60 = vld [vmem:[%s5322_s8 + $0xc8] sm:$0xff]  ;;  %v3305_v31 = vld [vmem:[%s5322_s8 + $0xf8] sm:$0xff] }
 0x315   :  { %4380 = vmatpush3.msra.mxu1 %v1709_v32  ;;  %4381 = vmatprep.mubr.msk.f32.mxu1 %vm4648_vm0, %v4647_v0  ;;  %v3298_v32 = vld [vmem:[%s5322_s8 + $0xc0] sm:$0xff] }
 0x316   :  { %4377 = vmatmul.mubr.msk.f32.vlgmr.msra.gmra.mxu0 %vm2601_vm3, %v2679_v33  ;;  %4389 = vmatprep.subr.mxu1 %v4647_v0  ;;  %v3304_v33 = vld [vmem:[%s5322_s8 + $0xf0] sm:$0xff] }
 0x317   :  { %v4524_v36 = vpop.eup %4523  ;;  %4385 = vmatpush3.msra.mxu0 %v1779_v34  ;;  %4386 = vmatprep.mubr.msk.f32.mxu0 %vm4648_vm0, %v4647_v0  ;;  %v3303_v34 = vld [vmem:[%s5322_s8 + $0xe8] sm:$0xff] }
 0x318   :  { %4394 = vmatprep.subr.mxu0 %v4647_v0  ;;  %v2681_v1 = vmul.f32 %v4524_v36, %v4508_v4 }
 0x319   :  { %v4526_v37 = vpop.eup %4525 }
 0x31a   :  { %4382 = vmatmul.mubr.msk.f32.vlgmr.msra.gmra.mxu1 %vm2601_vm3, %v2681_v1  ;;  %v2683_v40 = vmul.f32 %v4526_v37, %v4510_v8  ;;  %v3287_v8 = vld [vmem:[%s5322_s8 + $0x68] sm:$0xff] }
 0x31b   :  { %v4528_v41 = vpop.eup %4527  ;;  %4390 = vmatpush3.msra.mxu1 %v1849_v38  ;;  %4391 = vmatprep.mubr.msk.f32.mxu1 %vm4648_vm0, %v4647_v0 }
 0x31c   :  { %4387 = vmatmul.mubr.msk.f32.vlgmr.msra.gmra.mxu0 %vm2601_vm3, %v2683_v40  ;;  %4399 = vmatprep.subr.mxu1 %v4647_v0  ;;  %v2685_v2 = vmul.f32 %v4528_v41, %v5084_v10  ;;  %v3293_v10 = vld [vmem:[%s5322_s8 + $0x98] sm:$0xff] }
 0x31d   :  { %4395 = vmatpush3.msra.mxu0 %v1919_v42  ;;  %4396 = vmatprep.mubr.msk.f32.mxu0 %vm4648_vm0, %v4647_v0 }
 0x31e   :  { %4392 = vmatmul.mubr.msk.f32.vlgmr.msra.gmra.mxu1 %vm2601_vm3, %v2685_v2  ;;  %4404 = vmatprep.subr.mxu0 %v4647_v0 }
 0x31f   :  { %v4530_v5 = vpop.eup %4529  ;;  %4400 = vmatpush3.msra.mxu1 %v1989_v43  ;;  %4401 = vmatprep.mubr.msk.f32.mxu1 %vm4648_vm0, %v4647_v0 }
 0x320   :  { %v4532_v44 = vpop.eup %4531  ;;  %v2687_v45 = vmul.f32 %v4530_v5, %v5088_v12  ;;  %4415 = vmatprep.subr.mxu1 %v4647_v0 }
 0x321   :  { %v2689_v46 = vmul.f32 %v4532_v44, %v5090_v13  ;;  %v3292_v13 = vld [vmem:[%s5322_s8 + $0x90] sm:$0xff] }
 0x322   :  { %4397 = vmatmul.mubr.msk.f32.vlgmr.msra.gmra.mxu0 %vm2601_vm3, %v2687_v45 }
 0x323   :  { %4402 = vmatmul.mubr.msk.f32.vlgmr.msra.gmra.mxu1 %vm2601_vm3, %v2689_v46  ;;  %4405 = vmatpush3.msra.mxu0 %v3277_v6 }
 0x324   :  { %4406 = vmatprep.subr.mxu0 %v4647_v0  ;;  %4416 = vmatpush3.msra.mxu1 %v3281_v47 }
 0x325   :  { %4407 = vmatpush3.msra.mxu0 %v3276_v48  ;;  %4417 = vmatprep.subr.mxu1 %v4647_v0 }
 0x326   :  { %4408 = vmatprep.subr.mxu0 %v4647_v0  ;;  %4418 = vmatpush3.msra.mxu1 %v3280_v49 }
 0x327   :  { %4409 = vmatpush3.msra.mxu0 %v3275_v50  ;;  %4412 = vmatprep.mubr.msk.f32.mxu0 %vm4648_vm0, %v4647_v0 }
 0x328   :  { %4410 = vmatprep.subr.mxu0 %v4647_v0  ;;  %4419 = vmatprep.subr.mxu1 %v4647_v0 }
 0x329   :  { %4411 = vmatpush3.msra.mxu0 %v3274_v51  ;;  %4423 = vmatprep.mubr.msk.f32.mxu1 %vm4648_vm0, %v4647_v0 }
 0x32a   :  { %4426 = vmatprep.subr.mxu0 %v4647_v0  ;;  %4420 = vmatpush3.msra.mxu1 %v3279_v52 }
 0x32b   :  { %4421 = vmatprep.subr.mxu1 %v4647_v0 }
 0x32c   :  { %4422 = vmatpush3.msra.mxu1 %v3278_v53 }
 0x32d   :  { %4437 = vmatprep.subr.mxu1 %v4647_v0 }
 0x3d0   :  { %v2759_v55 = vpop.f32.mrf.mxu0 }
 0x3d1   :  { %4413 = vmatmul.mubr.msk.f32.vlgmr.msra.gmra.mxu0 %vm1992_vm2, %v2759_v55 }
 0x3d2   :  { %4427 = vmatpush3.msra.mxu0 %v3285_v54  ;;  %v4368_v57 = vpop.f32.mrf.mxu0  ;;  %4434 = vmatprep.mubr.msk.f32.mxu0 %vm4648_vm0, %v4647_v0 }
 0x3d3   :  { %4428 = vmatprep.subr.mxu0 %v4647_v0 }
 0x3d4   :  { %4429 = vmatpush3.msra.mxu0 %v3284_v56  ;;  %v2832_v62 = vpop.f32.mrf.mxu1 }
 0x3d5   :  { %4430 = vmatprep.subr.mxu0 %v4647_v0  ;;  %4424 = vmatmul.mubr.msk.f32.vlgmr.msra.gmra.mxu1 %vm1992_vm2, %v2832_v62 }
 0x3d6   :  { %v2905_v4 = vpop.f32.mrf.mxu0  ;;  %4431 = vmatpush3.msra.mxu0 %v3283_v58  ;;  %4438 = vmatpush3.msra.mxu1 %v3289_v59  ;;  %v4373_v7 = vpop.f32.mrf.mxu1  ;;  %v4011_v59 = vld [vmem:[%s5323_s9] ss:$0 sm:$0xff] }
 0x3d7   :  { %4432 = vmatprep.subr.mxu0 %v4647_v0  ;;  %4439 = vmatprep.subr.mxu1 %v4647_v0 }
 0x3d8   :  { %v4378_v9 = vpop.f32.mrf.mxu0  ;;  %4433 = vmatpush3.msra.mxu0 %v3282_v63  ;;  %4440 = vmatpush3.msra.mxu1 %v3288_v3 }
 0x3d9   :  { %4435 = vmatmul.mubr.msk.f32.vlgmr.msra.gmra.mxu0 %vm1992_vm2, %v2905_v4  ;;  %4441 = vmatprep.subr.mxu1 %v4647_v0 }
 0x3da   :  { %v2978_v12 = vpop.f32.mrf.mxu1  ;;  %4448 = vmatprep.subr.mxu0 %v4647_v0  ;;  %4442 = vmatpush3.msra.mxu1 %v3287_v8 }
 0x3db   :  { %4449 = vmatpush3.msra.mxu0 %v3293_v10  ;;  %4443 = vmatprep.subr.mxu1 %v4647_v0 }
 0x3dc   :  { %v3051_v14 = vpop.f32.mrf.mxu0  ;;  %v4383_v15 = vpop.f32.mrf.mxu1  ;;  %4450 = vmatprep.subr.mxu0 %v4647_v0  ;;  %4444 = vmatpush3.msra.mxu1 %v3286_v11 }
 0x3dd   :  { %4445 = vmatprep.mubr.msk.f32.mxu1 %vm4648_vm0, %v4647_v0  ;;  %4451 = vmatpush3.msra.mxu0 %v3292_v13 }
 0x3de   :  { %v4388_v18 = vpop.f32.mrf.mxu0  ;;  %v3124_v19 = vpop.f32.mrf.mxu1  ;;  %4446 = vmatmul.mubr.msk.f32.vlgmr.msra.gmra.mxu1 %vm1992_vm2, %v2978_v12  ;;  %4452 = vmatprep.subr.mxu0 %v4647_v0 }
 0x3df   :  { %4459 = vmatprep.subr.mxu1 %v4647_v0  ;;  %4453 = vmatpush3.msra.mxu0 %v3291_v16 }
 0x3e0   :  { %4460 = vmatpush3.msra.mxu1 %v3297_v17  ;;  %v4393_v22 = vpop.f32.mrf.mxu1  ;;  %4454 = vmatprep.subr.mxu0 %v4647_v0 }
 0x3e1   :  { %4461 = vmatprep.subr.mxu1 %v4647_v0  ;;  %4455 = vmatpush3.msra.mxu0 %v3290_v20 }
 0x3e2   :  { %v3197_v24 = vpop.f32.mrf.mxu0  ;;  %4456 = vmatprep.mubr.msk.f32.mxu0 %vm4648_vm0, %v4647_v0  ;;  %4462 = vmatpush3.msra.mxu1 %v3296_v21 }
 0x3e3   :  { %v3270_v26 = vpop.f32.mrf.mxu1  ;;  %4457 = vmatmul.mubr.msk.f32.vlgmr.msra.gmra.mxu0 %vm1992_vm2, %v3051_v14  ;;  %4463 = vmatprep.subr.mxu1 %v4647_v0 }
 0x3e4   :  { %v4398_v28 = vpop.f32.mrf.mxu0  ;;  %4470 = vmatprep.subr.mxu0 %v4647_v0  ;;  %4464 = vmatpush3.msra.mxu1 %v3295_v23 }
 0x3e5   :  { %4471 = vmatpush3.msra.mxu0 %v3301_v25  ;;  %v4403_v30 = vpop.f32.mrf.mxu1  ;;  %4465 = vmatprep.subr.mxu1 %v4647_v0 }
 0x3e6   :  { %4472 = vmatprep.subr.mxu0 %v4647_v0  ;;  %4466 = vmatpush3.msra.mxu1 %v3294_v27 }
 0x3e7   :  { %4467 = vmatprep.mubr.msk.f32.mxu1 %vm4648_vm0, %v4647_v0  ;;  %4473 = vmatpush3.msra.mxu0 %v3300_v29 }
 0x3e8   :  { %4468 = vmatmul.mubr.msk.f32.vlgmr.msra.gmra.mxu1 %vm1992_vm2, %v3124_v19  ;;  %4474 = vmatprep.subr.mxu0 %v4647_v0 }
 0x3e9   :  { %4481 = vmatprep.subr.mxu1 %v4647_v0  ;;  %4475 = vmatpush3.msra.mxu0 %v3299_v60 }
 0x3ea   :  { %4482 = vmatpush3.msra.mxu1 %v3305_v31  ;;  %4476 = vmatprep.subr.mxu0 %v4647_v0 }
 0x3eb   :  { %4483 = vmatprep.subr.mxu1 %v4647_v0  ;;  %4477 = vmatpush3.msra.mxu0 %v3298_v32 }
 0x3ec   :  { %4478 = vmatprep.mubr.msk.f32.mxu0 %vm4648_vm0, %v4647_v0  ;;  %4484 = vmatpush3.msra.mxu1 %v3304_v33 }
 0x3ed   :  { %4479 = vmatmul.mubr.msk.f32.vlgmr.msra.gmra.mxu0 %vm1992_vm2, %v3197_v24  ;;  %4485 = vmatprep.subr.mxu1 %v4647_v0 }
 0x3ee   :  { %4486 = vmatpush3.msra.mxu1 %v3303_v34  ;;  %4489 = vmatprep.mubr.msk.f32.mxu1 %vm4648_vm0, %v4647_v0 }
 0x3ef   :  { %4487 = vmatprep.subr.mxu1 %v4647_v0 }
 0x3f0   :  { %4488 = vmatpush3.msra.mxu1 %v3302_v35 }
 0x3f1   :  { %4490 = vmatmul.mubr.msk.f32.vlgmr.msra.gmra.mxu1 %vm1992_vm2, %v3270_v26 }
 0x491   :  { %v3375_v36 = vpop.f32.mrf.mxu0 }
 0x492   :  { %v3890_v43 = vsel %vm161_vm1, %v3375_v36, 0.0 }
 0x493   :  { %v4414_v61 = vpop.f32.mrf.mxu0 }
 0x495   :  { %v3448_v1 = vpop.f32.mrf.mxu1 }
 0x496   :  { %v3891_v42 = vsel %vm161_vm1, %v3448_v1, 0.0 }
 0x497   :  { %v4425_v37 = vpop.f32.mrf.mxu1  ;;  %v3892_v5 = vadd.f32 %v3891_v42, %v3890_v43 }
 0x499   :  { %v3521_v38 = vpop.f32.mrf.mxu0 }
 0x49a   :  { %v3893_v0 = vsel %vm161_vm1, %v3521_v38, 0.0 }
 0x49b   :  { %v4436_v39 = vpop.f32.mrf.mxu0  ;;  %v3894_v46 = vadd.f32 %v3893_v0, %v3892_v5 }
 0x49e   :  { %v3594_v40 = vpop.f32.mrf.mxu1 }
 0x49f   :  { %v3895_v45 = vsel %vm161_vm1, %v3594_v40, 0.0 }
 0x4a0   :  { %v4447_v41 = vpop.f32.mrf.mxu1  ;;  %v3896_v49 = vadd.f32 %v3895_v45, %v3894_v46 }
 0x4a3   :  { %v3667_v2 = vpop.f32.mrf.mxu0 }
 0x4a4   :  { %v3897_v47 = vsel %vm161_vm1, %v3667_v2, 0.0 }
 0x4a5   :  { %v4458_v44 = vpop.f32.mrf.mxu0  ;;  %v3898_v51 = vadd.f32 %v3897_v47, %v3896_v49 }
 0x4a8   :  { %v3740_v6 = vpop.f32.mrf.mxu1 }
 0x4a9   :  { %v3899_v50 = vsel %vm161_vm1, %v3740_v6, 0.0 }
 0x4aa   :  { %v4469_v48 = vpop.f32.mrf.mxu1  ;;  %v3900_v54 = vadd.f32 %v3899_v50, %v3898_v51 }
 0x4ad   :  { %v3813_v52 = vpop.f32.mrf.mxu0 }
 0x4ae   :  { %v3901_v53 = vsel %vm161_vm1, %v3813_v52, 0.0 }
 0x4af   :  { %v4480_v55 = vpop.f32.mrf.mxu0  ;;  %v3902_v56 = vadd.f32 %v3901_v53, %v3900_v54 }
 0x4b1   :  { %v3886_v57 = vpop.f32.mrf.mxu1 }
 0x4b2   :  { %v3903_v58 = vsel %vm161_vm1, %v3886_v57, 0.0 }
 0x4b3   :  { %v3904_v62 = vadd.f32 %v3903_v58, %v3902_v56  ;;  %v4491_v63 = vpop.f32.mrf.mxu1 }
 0x4b5   :  { %v3912_v3 = vadd.f32 %v4011_v59, %v3904_v62 }
 0x4b7   :  { %3913 = vst.msk [vmem:[#allocation10] sm:$0xff] %vm161_vm1, %v3912_v3 }
 0x4b8   :  { %4624 = shalt.err (!%p4621_p10)
}
 0x4b9   :  { %3923 = dma.vmem_to_hbm [thread:$0]  %s3921_s27, 128, %s5324_s10, [#allocation4]  }
 0x4ba   :  { %4639 = dma.done.wait [#allocation4], 128  }
 0x4bb   :  { %4640 = vsyncadd [#allocation4], 4294967168 }
 0x4bc   :  { %3927 = vsyncpa [#allocation3], 1 }
 0x4bd   :  { %3928 = vsyncpa [#allocation6], 1 }
 0x4be   :  { %3929 = vsyncpa [#allocation9], 1 }
 0x4bf   :  { %3930 = vsyncpa [#allocation4], 1 }

</bundles_post_ra>
